<compile_context>
chip_gen: v5e
topology: v5e:2x2
jax: 0.10.0
libtpu: 0.0.40
codegen_flags: <defaults>
</compile_context>

<pallas_src>
import functools

import jax
import jax.numpy as jnp
from jax import lax
from jax.experimental import pallas as pl
from jax.experimental.pallas import tpu as pltpu

BN_EPS = 1e-5


# --------------------------------------------------------------------------
# kernels
# --------------------------------------------------------------------------
def _conv3x3_rowband_kernel(x_ref, scale_ref, shift_ref, a_ref,
                            z_ref, stats_ref, rows_scr, *, apply_relu):
    """affine(+relu) -> 3x3 conv -> BN-stat accumulation; one image per grid step.

    x_ref:     (1, H, W*Cin)      lane-dense input rows
    scale_ref: (1, W*Cin)         per-(x,ci) affine scale (BN of previous stage, or 1)
    shift_ref: (1, W*Cin)         per-(x,ci) affine shift (or 0)
    a_ref:     (3, W*Cin, W*Cout) banded conv weights (one band per kernel row dy)
    z_ref:     (1, H, W*Cout)     pre-BN conv output (lane-dense)
    stats_ref: (2, W*Cout)        running [sum, sum-of-squares] per output column,
                                  accumulated across the whole grid (resident block)
    rows_scr:  (H+2, W*Cin)       persistent VMEM scratch; rows 0 and H+1 are the
                                  zero H-halo, zeroed once at grid step 0
    """
    h = x_ref.shape[1]
    n = pl.program_id(0)

    @pl.when(n == 0)
    def _init():
        rows_scr[...] = jnp.zeros_like(rows_scr)      # zero the H-halo once
        stats_ref[...] = jnp.zeros_like(stats_ref)    # init BN-stat accumulator

    # Previous-stage BN affine (+ReLU), fully lane-dense on the VPU.
    y = x_ref[0] * scale_ref[...] + shift_ref[...]
    if apply_relu:
        y = jnp.maximum(y, 0.0)

    # Interior rows of the zero-H-haloed row slab (halo rows stay zero).
    rows_scr[1:h + 1, :] = y

    # 3x3 conv == sum over the 3 kernel rows of (H, W*Cin) x (W*Cin, W*Cout)
    # banded matmuls: dx and ci are folded into the contraction dimension.
    z = jnp.dot(rows_scr[0:h, :], a_ref[0], preferred_element_type=jnp.float32)
    for dy in (1, 2):
        z = z + jnp.dot(rows_scr[dy:dy + h, :], a_ref[dy],
                        preferred_element_type=jnp.float32)

    # Per-column partial sums for the global (training-mode) batch-norm stats.
    stats_ref[0:1, :] += jnp.sum(z, axis=0, keepdims=True)
    stats_ref[1:2, :] += jnp.sum(z * z, axis=0, keepdims=True)

    # Lane-dense store of the pre-BN conv output.
    z_ref[0] = z.astype(z_ref.dtype)


def _bn_add_relu_kernel(z_ref, x_ref, scale_ref, shift_ref, o_ref):
    """out = relu(bn2(z) + identity), fully lane-dense elementwise."""
    out = z_ref[0] * scale_ref[...] + shift_ref[...] + x_ref[0]
    o_ref[0] = jnp.maximum(out, 0.0).astype(o_ref.dtype)


# --------------------------------------------------------------------------
# wrapper helpers
# --------------------------------------------------------------------------
def _banded_conv_weights(w_hwio, width):
    """Fold a (3,3,Cin,Cout) kernel into 3 banded (W*Cin, W*Cout) matrices.

    a[dy, xin*Cin + ci, x*Cout + co] = w[dy, xin - x + 1, ci, co]; taps that fall
    outside [0, W) (the zero W-halo) are simply dropped from the band.
    """
    _, _, cin, cout = w_hwio.shape
    xin = jnp.arange(width)[:, None]
    xout = jnp.arange(width)[None, :]
    ind = jnp.stack([(xin == xout + dx - 1).astype(w_hwio.dtype)
                     for dx in range(3)])                 # (3, W, W)
    a = jnp.einsum('kpx,ykio->ypixo', ind, w_hwio)        # (dy, xin, ci, x, co)
    return a.reshape(3, width * cin, width * cout)


def _bn_scale_shift(stats_cols, gamma, beta, count, width):
    """Finalize accumulated [sum, sumsq] columns into tiled per-(x,c) scale/shift."""
    c = gamma.shape[0]
    s = stats_cols.reshape(2, width, c).sum(axis=1)       # (2, C)
    mean = s[0] / count
    var = jnp.maximum(s[1] / count - mean * mean, 0.0)    # biased var (training BN)
    scale = gamma * lax.rsqrt(var + BN_EPS)
    shift = beta - mean * scale
    return (jnp.tile(scale.reshape(1, c), (1, width)),
            jnp.tile(shift.reshape(1, c), (1, width)))


def _conv_pass(x_dense, scale_t, shift_t, a, *, apply_relu):
    """One gridded conv+stats pass over the batch."""
    n, h, wc = x_dense.shape
    wco = a.shape[-1]
    kernel = functools.partial(_conv3x3_rowband_kernel, apply_relu=apply_relu)
    z, stats = pl.pallas_call(
        kernel,
        grid=(n,),
        in_specs=[
            pl.BlockSpec((1, h, wc), lambda i: (i, 0, 0)),      # activation rows
            pl.BlockSpec((1, wc), lambda i: (0, 0)),            # affine scale
            pl.BlockSpec((1, wc), lambda i: (0, 0)),            # affine shift
            pl.BlockSpec((3, wc, wco), lambda i: (0, 0, 0)),    # banded weights
        ],
        out_specs=(
            pl.BlockSpec((1, h, wco), lambda i: (i, 0, 0)),     # pre-BN conv out
            pl.BlockSpec((2, wco), lambda i: (0, 0)),           # resident stats acc
        ),
        out_shape=(
            jax.ShapeDtypeStruct((n, h, wco), jnp.float32),
            jax.ShapeDtypeStruct((2, wco), jnp.float32),
        ),
        scratch_shapes=[pltpu.VMEM((h + 2, wc), jnp.float32)],
        compiler_params=pltpu.CompilerParams(
            # batch axis carries the BN-stat reduction -> must be "arbitrary"
            dimension_semantics=("arbitrary",),
            vmem_limit_bytes=32 * 1024 * 1024,
        ),
    )(x_dense, scale_t, shift_t, a)
    return z, stats


def _bn_add_relu_pass(z, x_dense, scale_t, shift_t):
    n, h, wc = z.shape
    return pl.pallas_call(
        _bn_add_relu_kernel,
        grid=(n,),
        in_specs=[
            pl.BlockSpec((1, h, wc), lambda i: (i, 0, 0)),
            pl.BlockSpec((1, h, wc), lambda i: (i, 0, 0)),
            pl.BlockSpec((1, wc), lambda i: (0, 0)),
            pl.BlockSpec((1, wc), lambda i: (0, 0)),
        ],
        out_specs=pl.BlockSpec((1, h, wc), lambda i: (i, 0, 0)),
        out_shape=jax.ShapeDtypeStruct((n, h, wc), jnp.float32),
        compiler_params=pltpu.CompilerParams(
            dimension_semantics=("parallel",),   # pure elementwise -> megacore-shardable
            vmem_limit_bytes=32 * 1024 * 1024,
        ),
    )(z, x_dense, scale_t, shift_t)


# --------------------------------------------------------------------------
# BasicBlock forward (stride = 1, downsample = None)
# --------------------------------------------------------------------------
@jax.jit
def basic_block_forward(x_nchw, params):
    """params = (w1[3,3,Cin,Cout], g1[C], b1[C], w2[3,3,C,C], g2[C], b2[C])."""
    w1, g1, b1, w2, g2, b2 = params
    n, c, h, w = x_nchw.shape
    cout = w1.shape[-1]
    assert c == cout, "stride=1 BasicBlock needs in_features == out_features"
    wc = w * c
    count = n * h * w

    x_dense = jnp.transpose(x_nchw, (0, 2, 3, 1)).reshape(n, h, wc).astype(jnp.float32)
    a1 = _banded_conv_weights(w1.astype(jnp.float32), w)
    a2 = _banded_conv_weights(w2.astype(jnp.float32), w)
    ones_t = jnp.ones((1, wc), jnp.float32)
    zeros_t = jnp.zeros((1, wc), jnp.float32)

    # pass 1: conv1 + BN1 statistics
    z1, stats1 = _conv_pass(x_dense, ones_t, zeros_t, a1, apply_relu=False)
    s1, t1 = _bn_scale_shift(stats1, g1.astype(jnp.float32), b1.astype(jnp.float32),
                             count, w)
    # pass 2: bn1 + relu + conv2 + BN2 statistics (fused)
    z2, stats2 = _conv_pass(z1, s1, t1, a2, apply_relu=True)
    s2, t2 = _bn_scale_shift(stats2, g2.astype(jnp.float32), b2.astype(jnp.float32),
                             count, w)
    # pass 3: bn2 + identity add + relu
    out_dense = _bn_add_relu_pass(z2, x_dense, s2, t2)

    out = out_dense.reshape(n, h, w, c)
    return jnp.transpose(out, (0, 3, 1, 2)).astype(x_nchw.dtype)


# --------------------------------------------------------------------------
# pure-JAX reference (same forward semantics) for correctness checking
# --------------------------------------------------------------------------
def ref_forward(x_nchw, params):
    w1, g1, b1, w2, g2, b2 = params
    x = jnp.transpose(x_nchw, (0, 2, 3, 1))

    def bn(z, g, b):
        mean = jnp.mean(z, axis=(0, 1, 2), keepdims=True)
        var = jnp.mean((z - mean) ** 2, axis=(0, 1, 2), keepdims=True)
        return g * (z - mean) * lax.rsqrt(var + BN_EPS) + b

    dn = ("NHWC", "HWIO", "NHWC")
    out = lax.conv_general_dilated(x, w1, (1, 1), "SAME", dimension_numbers=dn)
    out = jax.nn.relu(bn(out, g1, b1))
    out = lax.conv_general_dilated(out, w2, (1, 1), "SAME", dimension_numbers=dn)
    out = jax.nn.relu(bn(out, g2, b2) + x)
    return jnp.transpose(out, (0, 3, 1, 2))


if __name__ == "__main__":
    N, C, H, W = 2, 8, 16, 16   # in_features = out_features = 8, stride = 1
    key = jax.random.PRNGKey(0)
    kx, k1, k2, kg1, kb1, kg2, kb2 = jax.random.split(key, 7)

    x = jax.random.normal(kx, (N, C, H, W), jnp.float32)

    wscale = 1.0 / (C * 9) ** 0.5
    w1 = jax.random.normal(k1, (3, 3, C, C), jnp.float32) * wscale   # HWIO
    w2 = jax.random.normal(k2, (3, 3, C, C), jnp.float32) * wscale
    g1 = 1.0 + 0.1 * jax.random.normal(kg1, (C,), jnp.float32)
    b1 = 0.05 * jax.random.normal(kb1, (C,), jnp.float32)
    g2 = 1.0 + 0.1 * jax.random.normal(kg2, (C,), jnp.float32)
    b2 = 0.05 * jax.random.normal(kb2, (C,), jnp.float32)
    params = (w1, g1, b1, w2, g2, b2)

    out = jax.block_until_ready(basic_block_forward(x, params))
    ref = jax.block_until_ready(ref_forward(x, params))

    assert out.shape == (N, C, H, W), out.shape
    max_err = float(jnp.max(jnp.abs(out - ref)))
    assert jnp.allclose(out, ref, atol=2e-3, rtol=2e-3), max_err
    print("KERNEL_OK")
</pallas_src>

<mosaic_0001>
module attributes {stable_mosaic.version = 11 : i64} {
  func.func @_conv3x3_rowband_kernel(%arg0: i32, %arg1: memref<1x16x128xf32, #tpu.memory_space<vmem>>, %arg2: memref<1x128xf32, #tpu.memory_space<vmem>>, %arg3: memref<1x128xf32, #tpu.memory_space<vmem>>, %arg4: memref<3x128x128xf32, #tpu.memory_space<vmem>>, %arg5: memref<1x16x128xf32, #tpu.memory_space<vmem>>, %arg6: memref<2x128xf32, #tpu.memory_space<vmem>>, %arg7: memref<18x128xf32, #tpu.memory_space<vmem>>) attributes {dimension_semantics = [#tpu.dimension_semantics<arbitrary>], iteration_bounds = array<i64: 2>, scalar_prefetch = 0 : i64, scratch_operands = 1 : i64, tpu.core_type = #tpu.core_type<tc>, window_params = [{transform_indices = @transform_0, window_bounds = array<i64: 1, 16, 128>}, {pipeline_mode = #tpu.pipeline_mode<synchronous>, transform_indices = @transform_1, window_bounds = array<i64: 1, 128>}, {pipeline_mode = #tpu.pipeline_mode<synchronous>, transform_indices = @transform_2, window_bounds = array<i64: 1, 128>}, {pipeline_mode = #tpu.pipeline_mode<synchronous>, transform_indices = @transform_3, window_bounds = array<i64: 3, 128, 128>}, {transform_indices = @transform_4, window_bounds = array<i64: 1, 16, 128>}, {pipeline_mode = #tpu.pipeline_mode<synchronous>, transform_indices = @transform_5, window_bounds = array<i64: 2, 128>}]} {
    %c0_i32 = arith.constant 0 : i32
    %0 = arith.cmpi eq, %arg0, %c0_i32 : i32
    %1 = arith.extui %0 : i1 to i32
    %c0_i32_0 = arith.constant 0 : i32
    %2 = arith.cmpi ne, %1, %c0_i32_0 : i32
    scf.if %2 {
      %cst_37 = arith.constant 0.000000e+00 : f32
      %40 = vector.broadcast %cst_37 : f32 to vector<18x128xf32>
      %c0_38 = arith.constant 0 : index
      %c0_39 = arith.constant 0 : index
      %41 = vector.load %arg7[%c0_38, %c0_39] : memref<18x128xf32, #tpu.memory_space<vmem>>, vector<18x128xf32>
      tpu.vector_store %arg7[%c0_38, %c0_39], %40 {strides = array<i32>} : memref<18x128xf32, #tpu.memory_space<vmem>>, vector<18x128xf32>,
      %cst_40 = arith.constant 0.000000e+00 : f32
      %42 = vector.broadcast %cst_40 : f32 to vector<2x128xf32>
      %c0_41 = arith.constant 0 : index
      %c0_42 = arith.constant 0 : index
      %43 = vector.load %arg6[%c0_41, %c0_42] : memref<2x128xf32, #tpu.memory_space<vmem>>, vector<2x128xf32>
      tpu.vector_store %arg6[%c0_41, %c0_42], %42 {strides = array<i32>} : memref<2x128xf32, #tpu.memory_space<vmem>>, vector<2x128xf32>,
    } else {
    }
    %c0 = arith.constant 0 : index
    %c0_1 = arith.constant 0 : index
    %c0_2 = arith.constant 0 : index
    %3 = vector.load %arg1[%c0, %c0_1, %c0_2] : memref<1x16x128xf32, #tpu.memory_space<vmem>>, vector<1x16x128xf32>
    %4 = vector.shape_cast %3 : vector<1x16x128xf32> to vector<16x128xf32>
    %c0_3 = arith.constant 0 : index
    %c0_4 = arith.constant 0 : index
    %5 = vector.load %arg2[%c0_3, %c0_4] : memref<1x128xf32, #tpu.memory_space<vmem>>, vector<1x128xf32>
    %6 = vector.broadcast %5 : vector<1x128xf32> to vector<16x128xf32>
    %7 = arith.mulf %4, %6 : vector<16x128xf32>
    %c0_5 = arith.constant 0 : index
    %c0_6 = arith.constant 0 : index
    %8 = vector.load %arg3[%c0_5, %c0_6] : memref<1x128xf32, #tpu.memory_space<vmem>>, vector<1x128xf32>
    %9 = vector.broadcast %8 : vector<1x128xf32> to vector<16x128xf32>
    %10 = arith.addf %7, %9 : vector<16x128xf32>
    %c1 = arith.constant 1 : index
    %c0_7 = arith.constant 0 : index
    %11 = vector.load %arg7[%c1, %c0_7] : memref<18x128xf32, #tpu.memory_space<vmem>>, vector<16x128xf32>
    tpu.vector_store %arg7[%c1, %c0_7], %10 {strides = array<i32>} : memref<18x128xf32, #tpu.memory_space<vmem>>, vector<16x128xf32>,
    %c0_8 = arith.constant 0 : index
    %c0_9 = arith.constant 0 : index
    %12 = vector.load %arg7[%c0_8, %c0_9] : memref<18x128xf32, #tpu.memory_space<vmem>>, vector<16x128xf32>
    %c0_10 = arith.constant 0 : index
    %c0_11 = arith.constant 0 : index
    %c0_12 = arith.constant 0 : index
    %13 = vector.load %arg4[%c0_10, %c0_11, %c0_12] : memref<3x128x128xf32, #tpu.memory_space<vmem>>, vector<1x128x128xf32>
    %14 = vector.shape_cast %13 : vector<1x128x128xf32> to vector<128x128xf32>
    %cst = arith.constant dense<0.000000e+00> : vector<16x128xf32>
    %15 = tpu.matmul %12, %14, %cst {dimension_numbers = #tpu.dot_dimension_numbers<[1], [0], [0], [1], [0, 0, 1, 1], [], []>} : vector<16x128xf32>, vector<128x128xf32>, vector<16x128xf32> -> vector<16x128xf32>
    %c1_13 = arith.constant 1 : index
    %c0_14 = arith.constant 0 : index
    %16 = vector.load %arg7[%c1_13, %c0_14] : memref<18x128xf32, #tpu.memory_space<vmem>>, vector<16x128xf32>
    %c1_15 = arith.constant 1 : index
    %c0_16 = arith.constant 0 : index
    %c0_17 = arith.constant 0 : index
    %17 = vector.load %arg4[%c1_15, %c0_16, %c0_17] : memref<3x128x128xf32, #tpu.memory_space<vmem>>, vector<1x128x128xf32>
    %18 = vector.shape_cast %17 : vector<1x128x128xf32> to vector<128x128xf32>
    %cst_18 = arith.constant dense<0.000000e+00> : vector<16x128xf32>
    %19 = tpu.matmul %16, %18, %cst_18 {dimension_numbers = #tpu.dot_dimension_numbers<[1], [0], [0], [1], [0, 0, 1, 1], [], []>} : vector<16x128xf32>, vector<128x128xf32>, vector<16x128xf32> -> vector<16x128xf32>
    %20 = arith.addf %15, %19 : vector<16x128xf32>
    %c2 = arith.constant 2 : index
    %c0_19 = arith.constant 0 : index
    %21 = vector.load %arg7[%c2, %c0_19] : memref<18x128xf32, #tpu.memory_space<vmem>>, vector<16x128xf32>
    %c2_20 = arith.constant 2 : index
    %c0_21 = arith.constant 0 : index
    %c0_22 = arith.constant 0 : index
    %22 = vector.load %arg4[%c2_20, %c0_21, %c0_22] : memref<3x128x128xf32, #tpu.memory_space<vmem>>, vector<1x128x128xf32>
    %23 = vector.shape_cast %22 : vector<1x128x128xf32> to vector<128x128xf32>
    %cst_23 = arith.constant dense<0.000000e+00> : vector<16x128xf32>
    %24 = tpu.matmul %21, %23, %cst_23 {dimension_numbers = #tpu.dot_dimension_numbers<[1], [0], [0], [1], [0, 0, 1, 1], [], []>} : vector<16x128xf32>, vector<128x128xf32>, vector<16x128xf32> -> vector<16x128xf32>
    %25 = arith.addf %20, %24 : vector<16x128xf32>
    %c0_24 = arith.constant 0 : index
    %c0_25 = arith.constant 0 : index
    %26 = vector.load %arg6[%c0_24, %c0_25] : memref<2x128xf32, #tpu.memory_space<vmem>>, vector<1x128xf32>
    %cst_26 = arith.constant dense<0.000000e+00> : vector<128xf32>
    %27 = vector.multi_reduction <add>, %25, %cst_26 [0] : vector<16x128xf32> to vector<128xf32>
    %28 = vector.shape_cast %27 : vector<128xf32> to vector<1x128xf32>
    %29 = arith.addf %26, %28 : vector<1x128xf32>
    %c0_27 = arith.constant 0 : index
    %c0_28 = arith.constant 0 : index
    %30 = vector.load %arg6[%c0_27, %c0_28] : memref<2x128xf32, #tpu.memory_space<vmem>>, vector<1x128xf32>
    tpu.vector_store %arg6[%c0_27, %c0_28], %29 {strides = array<i32>} : memref<2x128xf32, #tpu.memory_space<vmem>>, vector<1x128xf32>,
    %c1_29 = arith.constant 1 : index
    %c0_30 = arith.constant 0 : index
    %31 = vector.load %arg6[%c1_29, %c0_30] : memref<2x128xf32, #tpu.memory_space<vmem>>, vector<1x128xf32>
    %32 = arith.mulf %25, %25 : vector<16x128xf32>
    %cst_31 = arith.constant dense<0.000000e+00> : vector<128xf32>
    %33 = vector.multi_reduction <add>, %32, %cst_31 [0] : vector<16x128xf32> to vector<128xf32>
    %34 = vector.shape_cast %33 : vector<128xf32> to vector<1x128xf32>
    %35 = arith.addf %31, %34 : vector<1x128xf32>
    %c1_32 = arith.constant 1 : index
    %c0_33 = arith.constant 0 : index
    %36 = vector.load %arg6[%c1_32, %c0_33] : memref<2x128xf32, #tpu.memory_space<vmem>>, vector<1x128xf32>
    tpu.vector_store %arg6[%c1_32, %c0_33], %35 {strides = array<i32>} : memref<2x128xf32, #tpu.memory_space<vmem>>, vector<1x128xf32>,
    %c0_34 = arith.constant 0 : index
    %c0_35 = arith.constant 0 : index
    %c0_36 = arith.constant 0 : index
    %37 = vector.load %arg5[%c0_34, %c0_35, %c0_36] : memref<1x16x128xf32, #tpu.memory_space<vmem>>, vector<1x16x128xf32>
    %38 = vector.shape_cast %37 : vector<1x16x128xf32> to vector<16x128xf32>
    %39 = vector.shape_cast %25 : vector<16x128xf32> to vector<1x16x128xf32>
    tpu.vector_store %arg5[%c0_34, %c0_35, %c0_36], %39 {strides = array<i32>} : memref<1x16x128xf32, #tpu.memory_space<vmem>>, vector<1x16x128xf32>,
    return
  }
  func.func @transform_0(%arg0: i32) -> (i32, i32, i32) {
    %c0_i32 = arith.constant 0 : i32
    %c0_i32_0 = arith.constant 0 : i32
    %c0_i32_1 = arith.constant 0 : i32
    return %arg0, %c0_i32, %c0_i32_0 : i32, i32, i32
  }
  func.func @transform_1(%arg0: i32) -> (i32, i32) {
    %c0_i32 = arith.constant 0 : i32
    %c0_i32_0 = arith.constant 0 : i32
    %c0_i32_1 = arith.constant 0 : i32
    return %c0_i32, %c0_i32_0 : i32, i32
  }
  func.func @transform_2(%arg0: i32) -> (i32, i32) {
    %c0_i32 = arith.constant 0 : i32
    %c0_i32_0 = arith.constant 0 : i32
    %c0_i32_1 = arith.constant 0 : i32
    return %c0_i32, %c0_i32_0 : i32, i32
  }
  func.func @transform_3(%arg0: i32) -> (i32, i32, i32) {
    %c0_i32 = arith.constant 0 : i32
    %c0_i32_0 = arith.constant 0 : i32
    %c0_i32_1 = arith.constant 0 : i32
    %c0_i32_2 = arith.constant 0 : i32
    return %c0_i32, %c0_i32_0, %c0_i32_1 : i32, i32, i32
  }
  func.func @transform_4(%arg0: i32) -> (i32, i32, i32) {
    %c0_i32 = arith.constant 0 : i32
    %c0_i32_0 = arith.constant 0 : i32
    %c0_i32_1 = arith.constant 0 : i32
    return %arg0, %c0_i32, %c0_i32_0 : i32, i32, i32
  }
  func.func @transform_5(%arg0: i32) -> (i32, i32) {
    %c0_i32 = arith.constant 0 : i32
    %c0_i32_0 = arith.constant 0 : i32
    %c0_i32_1 = arith.constant 0 : i32
    return %c0_i32, %c0_i32_0 : i32, i32
  }
}

module attributes {stable_mosaic.version = 11 : i64} {
  func.func @_conv3x3_rowband_kernel(%arg0: i32, %arg1: memref<1x16x128xf32, #tpu.memory_space<vmem>>, %arg2: memref<1x128xf32, #tpu.memory_space<vmem>>, %arg3: memref<1x128xf32, #tpu.memory_space<vmem>>, %arg4: memref<3x128x128xf32, #tpu.memory_space<vmem>>, %arg5: memref<1x16x128xf32, #tpu.memory_space<vmem>>, %arg6: memref<2x128xf32, #tpu.memory_space<vmem>>, %arg7: memref<18x128xf32, #tpu.memory_space<vmem>>) attributes {dimension_semantics = [#tpu.dimension_semantics<arbitrary>], iteration_bounds = array<i64: 2>, scalar_prefetch = 0 : i64, scratch_operands = 1 : i64, tpu.core_type = #tpu.core_type<tc>, window_params = [{transform_indices = @transform_0, window_bounds = array<i64: 1, 16, 128>}, {pipeline_mode = #tpu.pipeline_mode<synchronous>, transform_indices = @transform_1, window_bounds = array<i64: 1, 128>}, {pipeline_mode = #tpu.pipeline_mode<synchronous>, transform_indices = @transform_2, window_bounds = array<i64: 1, 128>}, {pipeline_mode = #tpu.pipeline_mode<synchronous>, transform_indices = @transform_3, window_bounds = array<i64: 3, 128, 128>}, {transform_indices = @transform_4, window_bounds = array<i64: 1, 16, 128>}, {pipeline_mode = #tpu.pipeline_mode<synchronous>, transform_indices = @transform_5, window_bounds = array<i64: 2, 128>}]} {
    %c0_i32 = arith.constant 0 : i32
    %0 = arith.cmpi eq, %arg0, %c0_i32 : i32
    %1 = arith.extui %0 : i1 to i32
    %c0_i32_0 = arith.constant 0 : i32
    %2 = arith.cmpi ne, %1, %c0_i32_0 : i32
    scf.if %2 {
      %cst_38 = arith.constant 0.000000e+00 : f32
      %42 = vector.broadcast %cst_38 : f32 to vector<18x128xf32>
      %c0_39 = arith.constant 0 : index
      %c0_40 = arith.constant 0 : index
      %43 = vector.load %arg7[%c0_39, %c0_40] : memref<18x128xf32, #tpu.memory_space<vmem>>, vector<18x128xf32>
      tpu.vector_store %arg7[%c0_39, %c0_40], %42 {strides = array<i32>} : memref<18x128xf32, #tpu.memory_space<vmem>>, vector<18x128xf32>,
      %cst_41 = arith.constant 0.000000e+00 : f32
      %44 = vector.broadcast %cst_41 : f32 to vector<2x128xf32>
      %c0_42 = arith.constant 0 : index
      %c0_43 = arith.constant 0 : index
      %45 = vector.load %arg6[%c0_42, %c0_43] : memref<2x128xf32, #tpu.memory_space<vmem>>, vector<2x128xf32>
      tpu.vector_store %arg6[%c0_42, %c0_43], %44 {strides = array<i32>} : memref<2x128xf32, #tpu.memory_space<vmem>>, vector<2x128xf32>,
    } else {
    }
    %c0 = arith.constant 0 : index
    %c0_1 = arith.constant 0 : index
    %c0_2 = arith.constant 0 : index
    %3 = vector.load %arg1[%c0, %c0_1, %c0_2] : memref<1x16x128xf32, #tpu.memory_space<vmem>>, vector<1x16x128xf32>
    %4 = vector.shape_cast %3 : vector<1x16x128xf32> to vector<16x128xf32>
    %c0_3 = arith.constant 0 : index
    %c0_4 = arith.constant 0 : index
    %5 = vector.load %arg2[%c0_3, %c0_4] : memref<1x128xf32, #tpu.memory_space<vmem>>, vector<1x128xf32>
    %6 = vector.broadcast %5 : vector<1x128xf32> to vector<16x128xf32>
    %7 = arith.mulf %4, %6 : vector<16x128xf32>
    %c0_5 = arith.constant 0 : index
    %c0_6 = arith.constant 0 : index
    %8 = vector.load %arg3[%c0_5, %c0_6] : memref<1x128xf32, #tpu.memory_space<vmem>>, vector<1x128xf32>
    %9 = vector.broadcast %8 : vector<1x128xf32> to vector<16x128xf32>
    %10 = arith.addf %7, %9 : vector<16x128xf32>
    %cst = arith.constant 0.000000e+00 : f32
    %11 = vector.broadcast %cst : f32 to vector<16x128xf32>
    %12 = arith.maximumf %10, %11 : vector<16x128xf32>
    %c1 = arith.constant 1 : index
    %c0_7 = arith.constant 0 : index
    %13 = vector.load %arg7[%c1, %c0_7] : memref<18x128xf32, #tpu.memory_space<vmem>>, vector<16x128xf32>
    tpu.vector_store %arg7[%c1, %c0_7], %12 {strides = array<i32>} : memref<18x128xf32, #tpu.memory_space<vmem>>, vector<16x128xf32>,
    %c0_8 = arith.constant 0 : index
    %c0_9 = arith.constant 0 : index
    %14 = vector.load %arg7[%c0_8, %c0_9] : memref<18x128xf32, #tpu.memory_space<vmem>>, vector<16x128xf32>
    %c0_10 = arith.constant 0 : index
    %c0_11 = arith.constant 0 : index
    %c0_12 = arith.constant 0 : index
    %15 = vector.load %arg4[%c0_10, %c0_11, %c0_12] : memref<3x128x128xf32, #tpu.memory_space<vmem>>, vector<1x128x128xf32>
    %16 = vector.shape_cast %15 : vector<1x128x128xf32> to vector<128x128xf32>
    %cst_13 = arith.constant dense<0.000000e+00> : vector<16x128xf32>
    %17 = tpu.matmul %14, %16, %cst_13 {dimension_numbers = #tpu.dot_dimension_numbers<[1], [0], [0], [1], [0, 0, 1, 1], [], []>} : vector<16x128xf32>, vector<128x128xf32>, vector<16x128xf32> -> vector<16x128xf32>
    %c1_14 = arith.constant 1 : index
    %c0_15 = arith.constant 0 : index
    %18 = vector.load %arg7[%c1_14, %c0_15] : memref<18x128xf32, #tpu.memory_space<vmem>>, vector<16x128xf32>
    %c1_16 = arith.constant 1 : index
    %c0_17 = arith.constant 0 : index
    %c0_18 = arith.constant 0 : index
    %19 = vector.load %arg4[%c1_16, %c0_17, %c0_18] : memref<3x128x128xf32, #tpu.memory_space<vmem>>, vector<1x128x128xf32>
    %20 = vector.shape_cast %19 : vector<1x128x128xf32> to vector<128x128xf32>
    %cst_19 = arith.constant dense<0.000000e+00> : vector<16x128xf32>
    %21 = tpu.matmul %18, %20, %cst_19 {dimension_numbers = #tpu.dot_dimension_numbers<[1], [0], [0], [1], [0, 0, 1, 1], [], []>} : vector<16x128xf32>, vector<128x128xf32>, vector<16x128xf32> -> vector<16x128xf32>
    %22 = arith.addf %17, %21 : vector<16x128xf32>
    %c2 = arith.constant 2 : index
    %c0_20 = arith.constant 0 : index
    %23 = vector.load %arg7[%c2, %c0_20] : memref<18x128xf32, #tpu.memory_space<vmem>>, vector<16x128xf32>
    %c2_21 = arith.constant 2 : index
    %c0_22 = arith.constant 0 : index
    %c0_23 = arith.constant 0 : index
    %24 = vector.load %arg4[%c2_21, %c0_22, %c0_23] : memref<3x128x128xf32, #tpu.memory_space<vmem>>, vector<1x128x128xf32>
    %25 = vector.shape_cast %24 : vector<1x128x128xf32> to vector<128x128xf32>
    %cst_24 = arith.constant dense<0.000000e+00> : vector<16x128xf32>
    %26 = tpu.matmul %23, %25, %cst_24 {dimension_numbers = #tpu.dot_dimension_numbers<[1], [0], [0], [1], [0, 0, 1, 1], [], []>} : vector<16x128xf32>, vector<128x128xf32>, vector<16x128xf32> -> vector<16x128xf32>
    %27 = arith.addf %22, %26 : vector<16x128xf32>
    %c0_25 = arith.constant 0 : index
    %c0_26 = arith.constant 0 : index
    %28 = vector.load %arg6[%c0_25, %c0_26] : memref<2x128xf32, #tpu.memory_space<vmem>>, vector<1x128xf32>
    %cst_27 = arith.constant dense<0.000000e+00> : vector<128xf32>
    %29 = vector.multi_reduction <add>, %27, %cst_27 [0] : vector<16x128xf32> to vector<128xf32>
    %30 = vector.shape_cast %29 : vector<128xf32> to vector<1x128xf32>
    %31 = arith.addf %28, %30 : vector<1x128xf32>
    %c0_28 = arith.constant 0 : index
    %c0_29 = arith.constant 0 : index
    %32 = vector.load %arg6[%c0_28, %c0_29] : memref<2x128xf32, #tpu.memory_space<vmem>>, vector<1x128xf32>
    tpu.vector_store %arg6[%c0_28, %c0_29], %31 {strides = array<i32>} : memref<2x128xf32, #tpu.memory_space<vmem>>, vector<1x128xf32>,
    %c1_30 = arith.constant 1 : index
    %c0_31 = arith.constant 0 : index
    %33 = vector.load %arg6[%c1_30, %c0_31] : memref<2x128xf32, #tpu.memory_space<vmem>>, vector<1x128xf32>
    %34 = arith.mulf %27, %27 : vector<16x128xf32>
    %cst_32 = arith.constant dense<0.000000e+00> : vector<128xf32>
    %35 = vector.multi_reduction <add>, %34, %cst_32 [0] : vector<16x128xf32> to vector<128xf32>
    %36 = vector.shape_cast %35 : vector<128xf32> to vector<1x128xf32>
    %37 = arith.addf %33, %36 : vector<1x128xf32>
    %c1_33 = arith.constant 1 : index
    %c0_34 = arith.constant 0 : index
    %38 = vector.load %arg6[%c1_33, %c0_34] : memref<2x128xf32, #tpu.memory_space<vmem>>, vector<1x128xf32>
    tpu.vector_store %arg6[%c1_33, %c0_34], %37 {strides = array<i32>} : memref<2x128xf32, #tpu.memory_space<vmem>>, vector<1x128xf32>,
    %c0_35 = arith.constant 0 : index
    %c0_36 = arith.constant 0 : index
    %c0_37 = arith.constant 0 : index
    %39 = vector.load %arg5[%c0_35, %c0_36, %c0_37] : memref<1x16x128xf32, #tpu.memory_space<vmem>>, vector<1x16x128xf32>
    %40 = vector.shape_cast %39 : vector<1x16x128xf32> to vector<16x128xf32>
    %41 = vector.shape_cast %27 : vector<16x128xf32> to vector<1x16x128xf32>
    tpu.vector_store %arg5[%c0_35, %c0_36, %c0_37], %41 {strides = array<i32>} : memref<1x16x128xf32, #tpu.memory_space<vmem>>, vector<1x16x128xf32>,
    return
  }
  func.func @transform_0(%arg0: i32) -> (i32, i32, i32) {
    %c0_i32 = arith.constant 0 : i32
    %c0_i32_0 = arith.constant 0 : i32
    %c0_i32_1 = arith.constant 0 : i32
    return %arg0, %c0_i32, %c0_i32_0 : i32, i32, i32
  }
  func.func @transform_1(%arg0: i32) -> (i32, i32) {
    %c0_i32 = arith.constant 0 : i32
    %c0_i32_0 = arith.constant 0 : i32
    %c0_i32_1 = arith.constant 0 : i32
    return %c0_i32, %c0_i32_0 : i32, i32
  }
  func.func @transform_2(%arg0: i32) -> (i32, i32) {
    %c0_i32 = arith.constant 0 : i32
    %c0_i32_0 = arith.constant 0 : i32
    %c0_i32_1 = arith.constant 0 : i32
    return %c0_i32, %c0_i32_0 : i32, i32
  }
  func.func @transform_3(%arg0: i32) -> (i32, i32, i32) {
    %c0_i32 = arith.constant 0 : i32
    %c0_i32_0 = arith.constant 0 : i32
    %c0_i32_1 = arith.constant 0 : i32
    %c0_i32_2 = arith.constant 0 : i32
    return %c0_i32, %c0_i32_0, %c0_i32_1 : i32, i32, i32
  }
  func.func @transform_4(%arg0: i32) -> (i32, i32, i32) {
    %c0_i32 = arith.constant 0 : i32
    %c0_i32_0 = arith.constant 0 : i32
    %c0_i32_1 = arith.constant 0 : i32
    return %arg0, %c0_i32, %c0_i32_0 : i32, i32, i32
  }
  func.func @transform_5(%arg0: i32) -> (i32, i32) {
    %c0_i32 = arith.constant 0 : i32
    %c0_i32_0 = arith.constant 0 : i32
    %c0_i32_1 = arith.constant 0 : i32
    return %c0_i32, %c0_i32_0 : i32, i32
  }
}

module attributes {stable_mosaic.version = 11 : i64} {
  func.func @_bn_add_relu_kernel(%arg0: i32, %arg1: memref<1x16x128xf32, #tpu.memory_space<vmem>>, %arg2: memref<1x16x128xf32, #tpu.memory_space<vmem>>, %arg3: memref<1x128xf32, #tpu.memory_space<vmem>>, %arg4: memref<1x128xf32, #tpu.memory_space<vmem>>, %arg5: memref<1x16x128xf32, #tpu.memory_space<vmem>>) attributes {dimension_semantics = [#tpu.dimension_semantics<parallel>], iteration_bounds = array<i64: 2>, scalar_prefetch = 0 : i64, scratch_operands = 0 : i64, tpu.core_type = #tpu.core_type<tc>, window_params = [{transform_indices = @transform_0, window_bounds = array<i64: 1, 16, 128>}, {transform_indices = @transform_1, window_bounds = array<i64: 1, 16, 128>}, {pipeline_mode = #tpu.pipeline_mode<synchronous>, transform_indices = @transform_2, window_bounds = array<i64: 1, 128>}, {pipeline_mode = #tpu.pipeline_mode<synchronous>, transform_indices = @transform_3, window_bounds = array<i64: 1, 128>}, {transform_indices = @transform_4, window_bounds = array<i64: 1, 16, 128>}]} {
    %c0 = arith.constant 0 : index
    %c0_0 = arith.constant 0 : index
    %c0_1 = arith.constant 0 : index
    %0 = vector.load %arg1[%c0, %c0_0, %c0_1] : memref<1x16x128xf32, #tpu.memory_space<vmem>>, vector<1x16x128xf32>
    %1 = vector.shape_cast %0 : vector<1x16x128xf32> to vector<16x128xf32>
    %c0_2 = arith.constant 0 : index
    %c0_3 = arith.constant 0 : index
    %2 = vector.load %arg3[%c0_2, %c0_3] : memref<1x128xf32, #tpu.memory_space<vmem>>, vector<1x128xf32>
    %3 = vector.broadcast %2 : vector<1x128xf32> to vector<16x128xf32>
    %4 = arith.mulf %1, %3 : vector<16x128xf32>
    %c0_4 = arith.constant 0 : index
    %c0_5 = arith.constant 0 : index
    %5 = vector.load %arg4[%c0_4, %c0_5] : memref<1x128xf32, #tpu.memory_space<vmem>>, vector<1x128xf32>
    %6 = vector.broadcast %5 : vector<1x128xf32> to vector<16x128xf32>
    %7 = arith.addf %4, %6 : vector<16x128xf32>
    %c0_6 = arith.constant 0 : index
    %c0_7 = arith.constant 0 : index
    %c0_8 = arith.constant 0 : index
    %8 = vector.load %arg2[%c0_6, %c0_7, %c0_8] : memref<1x16x128xf32, #tpu.memory_space<vmem>>, vector<1x16x128xf32>
    %9 = vector.shape_cast %8 : vector<1x16x128xf32> to vector<16x128xf32>
    %10 = arith.addf %7, %9 : vector<16x128xf32>
    %cst = arith.constant 0.000000e+00 : f32
    %11 = vector.broadcast %cst : f32 to vector<16x128xf32>
    %12 = arith.maximumf %10, %11 : vector<16x128xf32>
    %c0_9 = arith.constant 0 : index
    %c0_10 = arith.constant 0 : index
    %c0_11 = arith.constant 0 : index
    %13 = vector.load %arg5[%c0_9, %c0_10, %c0_11] : memref<1x16x128xf32, #tpu.memory_space<vmem>>, vector<1x16x128xf32>
    %14 = vector.shape_cast %13 : vector<1x16x128xf32> to vector<16x128xf32>
    %15 = vector.shape_cast %12 : vector<16x128xf32> to vector<1x16x128xf32>
    tpu.vector_store %arg5[%c0_9, %c0_10, %c0_11], %15 {strides = array<i32>} : memref<1x16x128xf32, #tpu.memory_space<vmem>>, vector<1x16x128xf32>,
    return
  }
  func.func @transform_0(%arg0: i32) -> (i32, i32, i32) {
    %c0_i32 = arith.constant 0 : i32
    %c0_i32_0 = arith.constant 0 : i32
    %c0_i32_1 = arith.constant 0 : i32
    return %arg0, %c0_i32, %c0_i32_0 : i32, i32, i32
  }
  func.func @transform_1(%arg0: i32) -> (i32, i32, i32) {
    %c0_i32 = arith.constant 0 : i32
    %c0_i32_0 = arith.constant 0 : i32
    %c0_i32_1 = arith.constant 0 : i32
    return %arg0, %c0_i32, %c0_i32_0 : i32, i32, i32
  }
  func.func @transform_2(%arg0: i32) -> (i32, i32) {
    %c0_i32 = arith.constant 0 : i32
    %c0_i32_0 = arith.constant 0 : i32
    %c0_i32_1 = arith.constant 0 : i32
    return %c0_i32, %c0_i32_0 : i32, i32
  }
  func.func @transform_3(%arg0: i32) -> (i32, i32) {
    %c0_i32 = arith.constant 0 : i32
    %c0_i32_0 = arith.constant 0 : i32
    %c0_i32_1 = arith.constant 0 : i32
    return %c0_i32, %c0_i32_0 : i32, i32
  }
  func.func @transform_4(%arg0: i32) -> (i32, i32, i32) {
    %c0_i32 = arith.constant 0 : i32
    %c0_i32_0 = arith.constant 0 : i32
    %c0_i32_1 = arith.constant 0 : i32
    return %arg0, %c0_i32, %c0_i32_0 : i32, i32, i32
  }
}

</mosaic_0001>

<bundles_post_ra>
// kernel: basic_block_forward.3
= control target key start
LH: loop header
LB: loop body
LE: loop exit
PB: predicated region body
PF: predicated region fallthrough
CT: control target
= control target key end

     0   :  { %s571_s18 = smov 0   ;;  %s761_s0 = inlined_call_operand.vmem [shape: f32[2,16,128], index: 0, kind: input, shape index: {}]   ;;  %s762_s1 = inlined_call_operand.vmem [shape: f32[1,128], index: 1, kind: input, shape index: {}]   ;;  %s763_s2 = inlined_call_operand.vmem [shape: f32[1,128], index: 2, kind: input, shape index: {}]   ;;  %s764_s3 = inlined_call_operand.vmem [shape: f32[3,128,128], index: 3, kind: input, shape index: {}]   ;;  %s765_s4 = inlined_call_operand.vmem [shape: f32[2,16,128], index: 4, kind: output, shape index: {0}]   ;;  %s766_s5 = inlined_call_operand.vmem [shape: f32[2,128], index: 5, kind: output, shape index: {1}]  }
   0x1 LB: > { %s459_s19 = sadd.s32 4294967295, %s538_s18   ;;  %p463_p0 = scmp.ge.s32.totalorder %s538_s18, 1  ;;  %s538_s18 = sphi %s571_s18, %s16_s18  }
   0x2   : > { %p185_p1 = scmp.lt.s32.totalorder %s538_s18, 3 }
   0x4   : > { %p186_p2 = pnand %p463_p0, %p185_p1 }
   0x5   : > { %p213_p3 = scmp.lt.s32.totalorder (!%p186_p2), %s459_s19, 1  ;;  %p468_p4 = scmp.ne.s32.totalorder (!%p186_p2), %s459_s19, 0 }
   0x6   : > { %189 = sbr.rel (%p186_p2) target bundleno = 215 (0xd7), region = 36 }
   0xb   : > { %s214_s20 = scalar_select %p213_p3, %s459_s19, 1 }
   0xc   : > { %226 = sbr.rel (%p468_p4) target bundleno = 22 (0x16), region = 40 }
   0xd   : > { %s503_s21 = sshll.u32 %s214_s20, 4 }
   0xe   : > { %s582_s24 = scalar_lea.vmem %s761_s0, %s503_s21  ;;  %s587_s27 = scalar_lea.vmem %s765_s4, %s503_s21 }
  0x11   : > { %v540_v0 = vmov 0.0  }
  0x12   : > { %227 = vst [vmem:[#allocation2] sm:$0xff] %v540_v0 }
  0x13   : > { %228 = vst [vmem:[#allocation2 + $0x8] sm:$0xff] %v540_v0 }
  0x14   : > { %229 = vst [vmem:[#allocation2 + $0x10] sm:$0x3] %v540_v0 }
  0x15   : > { %230 = vst [vmem:[%s766_s5] sm:$0x3] %v540_v0 }
  0x16 PF: > { %v500_v1 = vld [vmem:[%s764_s3 + $0x178] sm:$0xff]  ;;  %v499_v2 = vld [vmem:[%s764_s3 + $0x170] sm:$0xff]  ;;  %v498_v6 = vld [vmem:[%s764_s3 + $0x168] sm:$0xff] }
  0x17   : > { %v484_v3 = vld [vmem:[%s764_s3 + $0xf8] sm:$0xff]  ;;  %349 = vmatpush.msra.mxu2 %v500_v1  ;;  %v483_v5 = vld [vmem:[%s764_s3 + $0xf0] sm:$0xff]  ;;  %v482_v8 = vld [vmem:[%s764_s3 + $0xe8] sm:$0xff] }
  0x18   : > { %284 = vmatpush.msra.mxu0 %v484_v3  ;;  %v264_v4 = vld [vmem:[%s764_s3 + $0x78] sm:$0xff]  ;;  %505 = vmatpush.msra.mxu3 %v484_v3  ;;  %v263_v7 = vld [vmem:[%s764_s3 + $0x70] sm:$0xff]  ;;  %v262_v9 = vld [vmem:[%s764_s3 + $0x68] sm:$0xff] }
  0x19   : > { %307 = vmatpush.msra.mxu1 %v264_v4  ;;  %350 = vmatpush.msra.mxu2 %v499_v2  ;;  %v497_v10 = vld [vmem:[%s764_s3 + $0x160] sm:$0xff]  ;;  %v496_v13 = vld [vmem:[%s764_s3 + $0x158] sm:$0xff]  ;;  %v495_v16 = vld [vmem:[%s764_s3 + $0x150] sm:$0xff] }
  0x1a   : > { %285 = vmatpush.msra.mxu0 %v483_v5  ;;  %506 = vmatpush.msra.mxu3 %v483_v5  ;;  %v481_v11 = vld [vmem:[%s764_s3 + $0xe0] sm:$0xff]  ;;  %v480_v14 = vld [vmem:[%s764_s3 + $0xd8] sm:$0xff]  ;;  %v479_v17 = vld [vmem:[%s764_s3 + $0xd0] sm:$0xff] }
  0x1b   : > { %308 = vmatpush.msra.mxu1 %v263_v7  ;;  %351 = vmatpush.msra.mxu2 %v498_v6  ;;  %v261_v12 = vld [vmem:[%s764_s3 + $0x60] sm:$0xff]  ;;  %v260_v15 = vld [vmem:[%s764_s3 + $0x58] sm:$0xff]  ;;  %v259_v18 = vld [vmem:[%s764_s3 + $0x50] sm:$0xff] }
  0x1c   : > { %286 = vmatpush.msra.mxu0 %v482_v8  ;;  %507 = vmatpush.msra.mxu3 %v482_v8  ;;  %v494_v19 = vld [vmem:[%s764_s3 + $0x148] sm:$0xff]  ;;  %v493_v22 = vld [vmem:[%s764_s3 + $0x140] sm:$0xff]  ;;  %v492_v24 = vld [vmem:[%s764_s3 + $0x138] sm:$0xff] }
  0x1d   : > { %309 = vmatpush.msra.mxu1 %v262_v9  ;;  %352 = vmatpush.msra.mxu2 %v497_v10  ;;  %v478_v20 = vld [vmem:[%s764_s3 + $0xc8] sm:$0xff]  ;;  %v477_v23 = vld [vmem:[%s764_s3 + $0xc0] sm:$0xff]  ;;  %v491_v26 = vld [vmem:[%s764_s3 + $0x130] sm:$0xff] }
  0x1e   : > { %287 = vmatpush.msra.mxu0 %v481_v11  ;;  %508 = vmatpush.msra.mxu3 %v481_v11  ;;  %v258_v21 = vld [vmem:[%s764_s3 + $0x48] sm:$0xff]  ;;  %v257_v25 = vld [vmem:[%s764_s3 + $0x40] sm:$0xff]  ;;  %v476_v27 = vld [vmem:[%s764_s3 + $0xb8] sm:$0xff] }
  0x1f   : > { %310 = vmatpush.msra.mxu1 %v261_v12  ;;  %353 = vmatpush.msra.mxu2 %v496_v13  ;;  %v256_v28 = vld [vmem:[%s764_s3 + $0x38] sm:$0xff]  ;;  %v231_v29 = vld [vmem:[%s582_s24] sm:$0xff]  ;;  %v232_v30 = vld [vmem:[%s582_s24 + $0x8] sm:$0xff] }
  0x20   : > { %288 = vmatpush.msra.mxu0 %v480_v14  ;;  %509 = vmatpush.msra.mxu3 %v480_v14  ;;  %v530_v31 = vld [vmem:[%s762_s1] ss:$0 sm:$0xff]  ;;  %v475_v32 = vld [vmem:[%s764_s3 + $0xb0] sm:$0xff]  ;;  %v490_v37 = vld [vmem:[%s764_s3 + $0x128] sm:$0xff] }
  0x21   : > { %311 = vmatpush.msra.mxu1 %v260_v15  ;;  %354 = vmatpush.msra.mxu2 %v495_v16  ;;  %v531_v33 = vld [vmem:[%s763_s2] ss:$0 sm:$0xff]  ;;  %v255_v34 = vld [vmem:[%s764_s3 + $0x30] sm:$0xff]  ;;  %v237_v35 = vmul.f32 %v530_v31, %v231_v29  ;;  %v238_v36 = vmul.f32 %v530_v31, %v232_v30  ;;  %v474_v38 = vld [vmem:[%s764_s3 + $0xa8] sm:$0xff] }
  0x22   : > { %289 = vmatpush.msra.mxu0 %v479_v17  ;;  %510 = vmatpush.msra.mxu3 %v479_v17  ;;  %v254_v39 = vld [vmem:[%s764_s3 + $0x28] sm:$0xff]  ;;  %v489_v42 = vld [vmem:[%s764_s3 + $0x120] sm:$0xff]  ;;  %v488_v45 = vld [vmem:[%s764_s3 + $0x118] sm:$0xff] }
  0x23   : > { %312 = vmatpush.msra.mxu1 %v259_v18  ;;  %355 = vmatpush.msra.mxu2 %v494_v19  ;;  %v243_v40 = vadd.f32 %v531_v33, %v237_v35  ;;  %v244_v41 = vadd.f32 %v531_v33, %v238_v36  ;;  %v473_v43 = vld [vmem:[%s764_s3 + $0xa0] sm:$0xff]  ;;  %v472_v46 = vld [vmem:[%s764_s3 + $0x98] sm:$0xff]  ;;  %v487_v48 = vld [vmem:[%s764_s3 + $0x110] sm:$0xff] }
  0x24   : > { %290 = vmatpush.msra.mxu0 %v478_v20  ;;  %511 = vmatpush.msra.mxu3 %v478_v20  ;;  %v253_v44 = vld [vmem:[%s764_s3 + $0x20] sm:$0xff]  ;;  %v252_v47 = vld [vmem:[%s764_s3 + $0x18] sm:$0xff]  ;;  %v471_v49 = vld [vmem:[%s764_s3 + $0x90] sm:$0xff] }
  0x25   : > { %313 = vmatpush.msra.mxu1 %v258_v21  ;;  %356 = vmatpush.msra.mxu2 %v493_v22  ;;  %245 = vst [vmem:[#allocation2 + $0x1] sm:$0xff] %v243_v40  ;;  %v251_v50 = vld [vmem:[%s764_s3 + $0x10] sm:$0xff]  ;;  %v486_v51 = vld [vmem:[%s764_s3 + $0x108] sm:$0xff]  ;;  %v485_v54 = vld [vmem:[%s764_s3 + $0x100] sm:$0xff] }
  0x26   : > { %291 = vmatpush.msra.mxu0 %v477_v23  ;;  %512 = vmatpush.msra.mxu3 %v477_v23  ;;  %246 = vst [vmem:[#allocation2 + $0x9] sm:$0xff] %v244_v41  ;;  %v470_v52 = vld [vmem:[%s764_s3 + $0x88] sm:$0xff]  ;;  %v469_v55 = vld [vmem:[%s764_s3 + $0x80] sm:$0xff] }
  0x27   : > { %314 = vmatpush.msra.mxu1 %v257_v25  ;;  %357 = vmatpush.msra.mxu2 %v492_v24  ;;  %v250_v53 = vld [vmem:[%s764_s3 + $0x8] sm:$0xff]  ;;  %v249_v57 = vld [vmem:[%s764_s3] sm:$0xff] }
  0x28   : > { %292 = vmatpush.msra.mxu0 %v476_v27  ;;  %513 = vmatpush.msra.mxu3 %v476_v27  ;;  %v374_v20 = vld [vmem:[%s766_s5] sm:$0x1]  ;;  %v384_v23 = vld [vmem:[%s766_s5 + $0x1] sm:$0x1] }
  0x29   : > { %315 = vmatpush.msra.mxu1 %v256_v28  ;;  %358 = vmatpush.msra.mxu2 %v491_v26 }
  0x2a   : > { %293 = vmatpush.msra.mxu0 %v475_v32  ;;  %514 = vmatpush.msra.mxu3 %v475_v32 }
  0x2b   : > { %316 = vmatpush.msra.mxu1 %v255_v34  ;;  %359 = vmatpush.msra.mxu2 %v490_v37 }
  0x2c   : > { %294 = vmatpush.msra.mxu0 %v474_v38  ;;  %515 = vmatpush.msra.mxu3 %v474_v38  ;;  %v247_v58 = vld [vmem:[#allocation2] sm:$0xff] }
  0x2d   : > { %317 = vmatpush.msra.mxu1 %v254_v39  ;;  %360 = vmatpush.msra.mxu2 %v489_v42  ;;  %v330_v56 = vld [vmem:[#allocation2 + $0x2] sm:$0xff]  ;;  %v331_v59 = vld [vmem:[#allocation2 + $0xa] sm:$0xff] }
  0x2e   : > { %295 = vmatpush.msra.mxu0 %v473_v43  ;;  %516 = vmatpush.msra.mxu3 %v473_v43  ;;  %v248_v60 = vld [vmem:[#allocation2 + $0x8] sm:$0xff] }
  0x2f   : > { %318 = vmatpush.msra.mxu1 %v253_v44  ;;  %361 = vmatpush.msra.mxu2 %v488_v45 }
  0x30   : > { %296 = vmatpush.msra.mxu0 %v472_v46  ;;  %517 = vmatpush.msra.mxu3 %v472_v46 }
  0x31   : > { %319 = vmatpush.msra.mxu1 %v252_v47  ;;  %362 = vmatpush.msra.mxu2 %v487_v48 }
  0x32   : > { %297 = vmatpush.msra.mxu0 %v471_v49  ;;  %518 = vmatpush.msra.mxu3 %v471_v49 }
  0x33   : > { %320 = vmatpush.msra.mxu1 %v251_v50  ;;  %363 = vmatpush.msra.mxu2 %v486_v51 }
  0x34   : > { %298 = vmatpush.msra.mxu0 %v470_v52  ;;  %519 = vmatpush.msra.mxu3 %v470_v52 }
  0x35   : > { %321 = vmatpush.msra.mxu1 %v250_v53  ;;  %364 = vmatpush.msra.mxu2 %v485_v54 }
  0x36   : > { %299 = vmatpush.msra.mxu0 %v469_v55  ;;  %365 = vmatmul.f32.vlgmr.msra.gmra.mxu2 %v330_v56 }
  0x37   : > { %322 = vmatpush.msra.mxu1 %v249_v57  ;;  %300 = vmatmul.f32.vlgmr.msra.gmra.mxu0 %v243_v40 }
  0x38   : > { %323 = vmatmul.f32.vlgmr.msra.gmra.mxu1 %v247_v58  ;;  %520 = vmatpush.msra.mxu3 %v469_v55 }
  0x39   : > { %303 = vmatmul.f32.vlgmr.msra.gmra.mxu3 %v244_v41 }
  0x3e   : > { %368 = vmatmul.f32.gmra.mxu2 %v331_v59 }
  0x40   : > { %326 = vmatmul.f32.gmra.mxu1 %v248_v60 }
  0xb4   : > { %v301_v61 = vpop.f32.mrf.mxu0 }
  0xb5   : > { %v324_v62 = vpop.f32.mrf.mxu1 }
  0xb6   : > { %v325_v63 = vadd.f32 %v324_v62, %v301_v61 }
  0xb9   : > { %v366_v0 = vpop.f32.mrf.mxu2 }
  0xba   : > { %v372_v1 = vadd.f32 %v366_v0, %v325_v63 }
  0xbc   : > { %396 = vst [vmem:[%s587_s27] sm:$0xff] %v372_v1  ;;  %v304_v2 = vpop.f32.mrf.mxu3  ;;  %v385_v7 = vmul.f32 %v372_v1, %v372_v1 }
  0xbd   : > { %v327_v3 = vpop.f32.mrf.mxu1 }
  0xbe   : > { %v328_v4 = vadd.f32 %v327_v3, %v304_v2 }
  0xc1   : > { %v369_v5 = vpop.f32.mrf.mxu2 }
  0xc2   : > { %v373_v6 = vadd.f32 %v369_v5, %v328_v4 }
  0xc4   : > { %v375_v8 = vadd.f32 %v373_v6, %v372_v1  ;;  %v386_v9 = vmul.f32 %v373_v6, %v373_v6  ;;  %397 = vst [vmem:[%s587_s27 + $0x8] sm:$0xff] %v373_v6 }
  0xc6   : > { %v376_v10 = vrot.slane %v375_v8, 4  ;;  %v387_v11 = vadd.f32 %v386_v9, %v385_v7 }
  0xc8   : > { %v377_v12 = vadd.f32 %v376_v10, %v375_v8  ;;  %v388_v13 = vrot.slane %v387_v11, 4 }
  0xca   : > { %v378_v14 = vrot.slane %v377_v12, 2  ;;  %v389_v15 = vadd.f32 %v388_v13, %v387_v11 }
  0xcc   : > { %v379_v16 = vadd.f32 %v378_v14, %v377_v12  ;;  %v390_v17 = vrot.slane %v389_v15, 2 }
  0xce   : > { %v380_v18 = vrot.slane %v379_v16, 1  ;;  %v391_v19 = vadd.f32 %v390_v17, %v389_v15 }
  0xd0   : > { %v381_v21 = vadd.f32 %v380_v18, %v379_v16  ;;  %v392_v22 = vrot.slane %v391_v19, 1 }
  0xd2   : > { %v382_v24 = vadd.f32 %v381_v21, %v374_v20  ;;  %v393_v25 = vadd.f32 %v392_v22, %v391_v19 }
  0xd4   : > { %383 = vst [vmem:[%s766_s5] sm:$0x1] %v382_v24  ;;  %v394_v26 = vadd.f32 %v393_v25, %v384_v23 }
  0xd6   : > { %395 = vst [vmem:[%s766_s5 + $0x1] sm:$0x1] %v394_v26 }
  0xd7 PF: > { %s16_s18 = sadd.s32 1, %s538_s18  }
  0xd8   : > { %p13_p5 = scmp.ge.s32.totalorder %s16_s18, 4  }
  0xda   :  { %15 = sbr.rel (!%p13_p5) target bundleno = 1 (0x1), region = 80 }

// kernel: basic_block_forward.5
= control target key start
LH: loop header
LB: loop body
LE: loop exit
PB: predicated region body
PF: predicated region fallthrough
CT: control target
= control target key end

     0   :  { %s366_s15 = smov 0   ;;  %s392_s0 = inlined_call_operand.vmem [shape: f32[2,16,128], index: 0, kind: input, shape index: {}]   ;;  %s393_s1 = inlined_call_operand.vmem [shape: f32[2,16,128], index: 1, kind: input, shape index: {}]   ;;  %s394_s2 = inlined_call_operand.vmem [shape: f32[1,128], index: 2, kind: input, shape index: {}]   ;;  %s395_s3 = inlined_call_operand.vmem [shape: f32[1,128], index: 3, kind: input, shape index: {}]   ;;  %s396_s4 = inlined_call_operand.vmem [shape: f32[2,16,128], index: 4, kind: output, shape index: {}]  }
   0x1 LB: > { %s307_s16 = sadd.s32 4294967295, %s339_s15   ;;  %p311_p0 = scmp.ge.s32.totalorder %s339_s15, 1  ;;  %s339_s15 = sphi %s366_s15, %s14_s15  }
   0x2   : > { %p172_p1 = scmp.lt.s32.totalorder %s339_s15, 3 }
   0x4   : > { %p173_p2 = pnand %p311_p0, %p172_p1 }
   0x5   : > { %p203_p3 = scmp.lt.s32.totalorder (!%p173_p2), %s307_s16, 1 }
   0x6   : > { %176 = sbr.rel (%p173_p2) target bundleno = 25 (0x19), region = 36 }
   0xb   : > { %s398_s16 = smov (!%p203_p3, %s307_s16), 1  ;;  %v331_v0 = vld [vmem:[%s394_s2] ss:$0 sm:$0xff] }
   0xc   : > { %s320_s19 = sshll.u32 %s398_s16, 4  ;;  %v332_v1 = vld [vmem:[%s395_s3] ss:$0 sm:$0xff] }
   0xd   : > { %s207_s22 = scalar_lea.vmem %s392_s0, %s320_s19  ;;  %s212_s25 = scalar_lea.vmem %s393_s1, %s320_s19 }
   0xe   : > { %v218_v2 = vld [vmem:[%s207_s22] sm:$0xff]  ;;  %v219_v3 = vld [vmem:[%s207_s22 + $0x8] sm:$0xff]  ;;  %s217_s30 = scalar_lea.vmem %s396_s4, %s320_s19 }
   0xf   : > { %v224_v4 = vmul.f32 %v331_v0, %v218_v2  ;;  %v225_v5 = vmul.f32 %v331_v0, %v219_v3  ;;  %v232_v6 = vld [vmem:[%s212_s25] sm:$0xff]  ;;  %v233_v7 = vld [vmem:[%s212_s25 + $0x8] sm:$0xff] }
  0x11   : > { %v230_v8 = vadd.f32 %v332_v1, %v224_v4  ;;  %v231_v9 = vadd.f32 %v332_v1, %v225_v5 }
  0x13   : > { %v234_v10 = vadd.f32 %v232_v6, %v230_v8  ;;  %v235_v11 = vadd.f32 %v233_v7, %v231_v9 }
  0x15   : > { %v236_v12 = vmax.f32 %v234_v10, 0.0  ;;  %v237_v13 = vmax.f32 %v235_v11, 0.0 }
  0x17   : > { %238 = vst [vmem:[%s217_s30] sm:$0xff] %v236_v12 }
  0x18   : > { %239 = vst [vmem:[%s217_s30 + $0x8] sm:$0xff] %v237_v13 }
  0x19 PF: > { %s14_s15 = sadd.s32 1, %s339_s15  }
  0x1a   : > { %p11_p4 = scmp.ge.s32.totalorder %s14_s15, 4  }
  0x1c   :  { %13 = sbr.rel (!%p11_p4) target bundleno = 1 (0x1), region = 69 }

// kernel: basic_block_forward.4
= control target key start
LH: loop header
LB: loop body
LE: loop exit
PB: predicated region body
PF: predicated region fallthrough
CT: control target
= control target key end

     0   :  { %s573_s18 = smov 0   ;;  %s763_s0 = inlined_call_operand.vmem [shape: f32[2,16,128], index: 0, kind: input, shape index: {}]   ;;  %s764_s1 = inlined_call_operand.vmem [shape: f32[1,128], index: 1, kind: input, shape index: {}]   ;;  %s765_s2 = inlined_call_operand.vmem [shape: f32[1,128], index: 2, kind: input, shape index: {}]   ;;  %s766_s3 = inlined_call_operand.vmem [shape: f32[3,128,128], index: 3, kind: input, shape index: {}]   ;;  %s767_s4 = inlined_call_operand.vmem [shape: f32[2,16,128], index: 4, kind: output, shape index: {0}]   ;;  %s768_s5 = inlined_call_operand.vmem [shape: f32[2,128], index: 5, kind: output, shape index: {1}]  }
   0x1 LB: > { %s461_s19 = sadd.s32 4294967295, %s540_s18   ;;  %p465_p0 = scmp.ge.s32.totalorder %s540_s18, 1  ;;  %s540_s18 = sphi %s573_s18, %s16_s18  }
   0x2   : > { %p185_p1 = scmp.lt.s32.totalorder %s540_s18, 3 }
   0x4   : > { %p186_p2 = pnand %p465_p0, %p185_p1 }
   0x5   : > { %p213_p3 = scmp.lt.s32.totalorder (!%p186_p2), %s461_s19, 1  ;;  %p470_p4 = scmp.ne.s32.totalorder (!%p186_p2), %s461_s19, 0 }
   0x6   : > { %189 = sbr.rel (%p186_p2) target bundleno = 215 (0xd7), region = 36 }
   0xb   : > { %s214_s20 = scalar_select %p213_p3, %s461_s19, 1 }
   0xc   : > { %226 = sbr.rel (%p470_p4) target bundleno = 22 (0x16), region = 40 }
   0xd   : > { %s505_s21 = sshll.u32 %s214_s20, 4 }
   0xe   : > { %s584_s24 = scalar_lea.vmem %s763_s0, %s505_s21  ;;  %s589_s27 = scalar_lea.vmem %s767_s4, %s505_s21 }
  0x11   : > { %v542_v0 = vmov 0.0  }
  0x12   : > { %227 = vst [vmem:[#allocation2] sm:$0xff] %v542_v0 }
  0x13   : > { %228 = vst [vmem:[#allocation2 + $0x8] sm:$0xff] %v542_v0 }
  0x14   : > { %229 = vst [vmem:[#allocation2 + $0x10] sm:$0x3] %v542_v0 }
  0x15   : > { %230 = vst [vmem:[%s768_s5] sm:$0x3] %v542_v0 }
  0x16 PF: > { %v502_v1 = vld [vmem:[%s766_s3 + $0x178] sm:$0xff]  ;;  %v501_v2 = vld [vmem:[%s766_s3 + $0x170] sm:$0xff]  ;;  %v500_v6 = vld [vmem:[%s766_s3 + $0x168] sm:$0xff] }
  0x17   : > { %v486_v3 = vld [vmem:[%s766_s3 + $0xf8] sm:$0xff]  ;;  %351 = vmatpush.msra.mxu2 %v502_v1  ;;  %v485_v5 = vld [vmem:[%s766_s3 + $0xf0] sm:$0xff]  ;;  %v484_v8 = vld [vmem:[%s766_s3 + $0xe8] sm:$0xff] }
  0x18   : > { %286 = vmatpush.msra.mxu0 %v486_v3  ;;  %v266_v4 = vld [vmem:[%s766_s3 + $0x78] sm:$0xff]  ;;  %507 = vmatpush.msra.mxu3 %v486_v3  ;;  %v265_v7 = vld [vmem:[%s766_s3 + $0x70] sm:$0xff]  ;;  %v264_v9 = vld [vmem:[%s766_s3 + $0x68] sm:$0xff] }
  0x19   : > { %309 = vmatpush.msra.mxu1 %v266_v4  ;;  %352 = vmatpush.msra.mxu2 %v501_v2  ;;  %v499_v10 = vld [vmem:[%s766_s3 + $0x160] sm:$0xff]  ;;  %v498_v13 = vld [vmem:[%s766_s3 + $0x158] sm:$0xff]  ;;  %v497_v16 = vld [vmem:[%s766_s3 + $0x150] sm:$0xff] }
  0x1a   : > { %287 = vmatpush.msra.mxu0 %v485_v5  ;;  %508 = vmatpush.msra.mxu3 %v485_v5  ;;  %v483_v11 = vld [vmem:[%s766_s3 + $0xe0] sm:$0xff]  ;;  %v482_v14 = vld [vmem:[%s766_s3 + $0xd8] sm:$0xff]  ;;  %v481_v17 = vld [vmem:[%s766_s3 + $0xd0] sm:$0xff] }
  0x1b   : > { %310 = vmatpush.msra.mxu1 %v265_v7  ;;  %353 = vmatpush.msra.mxu2 %v500_v6  ;;  %v263_v12 = vld [vmem:[%s766_s3 + $0x60] sm:$0xff]  ;;  %v262_v15 = vld [vmem:[%s766_s3 + $0x58] sm:$0xff]  ;;  %v261_v18 = vld [vmem:[%s766_s3 + $0x50] sm:$0xff] }
  0x1c   : > { %288 = vmatpush.msra.mxu0 %v484_v8  ;;  %509 = vmatpush.msra.mxu3 %v484_v8  ;;  %v496_v19 = vld [vmem:[%s766_s3 + $0x148] sm:$0xff]  ;;  %v495_v22 = vld [vmem:[%s766_s3 + $0x140] sm:$0xff]  ;;  %v494_v24 = vld [vmem:[%s766_s3 + $0x138] sm:$0xff] }
  0x1d   : > { %311 = vmatpush.msra.mxu1 %v264_v9  ;;  %354 = vmatpush.msra.mxu2 %v499_v10  ;;  %v480_v20 = vld [vmem:[%s766_s3 + $0xc8] sm:$0xff]  ;;  %v479_v23 = vld [vmem:[%s766_s3 + $0xc0] sm:$0xff]  ;;  %v493_v26 = vld [vmem:[%s766_s3 + $0x130] sm:$0xff] }
  0x1e   : > { %289 = vmatpush.msra.mxu0 %v483_v11  ;;  %510 = vmatpush.msra.mxu3 %v483_v11  ;;  %v260_v21 = vld [vmem:[%s766_s3 + $0x48] sm:$0xff]  ;;  %v259_v25 = vld [vmem:[%s766_s3 + $0x40] sm:$0xff]  ;;  %v478_v27 = vld [vmem:[%s766_s3 + $0xb8] sm:$0xff] }
  0x1f   : > { %312 = vmatpush.msra.mxu1 %v263_v12  ;;  %355 = vmatpush.msra.mxu2 %v498_v13  ;;  %v258_v28 = vld [vmem:[%s766_s3 + $0x38] sm:$0xff]  ;;  %v231_v29 = vld [vmem:[%s584_s24] sm:$0xff]  ;;  %v232_v30 = vld [vmem:[%s584_s24 + $0x8] sm:$0xff] }
  0x20   : > { %290 = vmatpush.msra.mxu0 %v482_v14  ;;  %511 = vmatpush.msra.mxu3 %v482_v14  ;;  %v532_v31 = vld [vmem:[%s764_s1] ss:$0 sm:$0xff]  ;;  %v477_v32 = vld [vmem:[%s766_s3 + $0xb0] sm:$0xff]  ;;  %v492_v37 = vld [vmem:[%s766_s3 + $0x128] sm:$0xff] }
  0x21   : > { %313 = vmatpush.msra.mxu1 %v262_v15  ;;  %356 = vmatpush.msra.mxu2 %v497_v16  ;;  %v533_v33 = vld [vmem:[%s765_s2] ss:$0 sm:$0xff]  ;;  %v257_v34 = vld [vmem:[%s766_s3 + $0x30] sm:$0xff]  ;;  %v237_v35 = vmul.f32 %v532_v31, %v231_v29  ;;  %v238_v36 = vmul.f32 %v532_v31, %v232_v30  ;;  %v476_v38 = vld [vmem:[%s766_s3 + $0xa8] sm:$0xff] }
  0x22   : > { %291 = vmatpush.msra.mxu0 %v481_v17  ;;  %512 = vmatpush.msra.mxu3 %v481_v17  ;;  %v256_v39 = vld [vmem:[%s766_s3 + $0x28] sm:$0xff]  ;;  %v491_v42 = vld [vmem:[%s766_s3 + $0x120] sm:$0xff]  ;;  %v490_v47 = vld [vmem:[%s766_s3 + $0x118] sm:$0xff] }
  0x23   : > { %314 = vmatpush.msra.mxu1 %v261_v18  ;;  %357 = vmatpush.msra.mxu2 %v496_v19  ;;  %v243_v40 = vadd.f32 %v533_v33, %v237_v35  ;;  %v244_v41 = vadd.f32 %v533_v33, %v238_v36  ;;  %v475_v43 = vld [vmem:[%s766_s3 + $0xa0] sm:$0xff]  ;;  %v474_v48 = vld [vmem:[%s766_s3 + $0x98] sm:$0xff]  ;;  %v489_v50 = vld [vmem:[%s766_s3 + $0x110] sm:$0xff] }
  0x24   : > { %292 = vmatpush.msra.mxu0 %v480_v20  ;;  %513 = vmatpush.msra.mxu3 %v480_v20  ;;  %v255_v44 = vld [vmem:[%s766_s3 + $0x20] sm:$0xff]  ;;  %v254_v49 = vld [vmem:[%s766_s3 + $0x18] sm:$0xff]  ;;  %v473_v51 = vld [vmem:[%s766_s3 + $0x90] sm:$0xff] }
  0x25   : > { %315 = vmatpush.msra.mxu1 %v260_v21  ;;  %358 = vmatpush.msra.mxu2 %v495_v22  ;;  %v245_v45 = vmax.f32 %v243_v40, 0.0  ;;  %v246_v46 = vmax.f32 %v244_v41, 0.0  ;;  %v253_v52 = vld [vmem:[%s766_s3 + $0x10] sm:$0xff]  ;;  %v488_v53 = vld [vmem:[%s766_s3 + $0x108] sm:$0xff]  ;;  %v487_v56 = vld [vmem:[%s766_s3 + $0x100] sm:$0xff] }
  0x26   : > { %293 = vmatpush.msra.mxu0 %v479_v23  ;;  %514 = vmatpush.msra.mxu3 %v479_v23  ;;  %v472_v54 = vld [vmem:[%s766_s3 + $0x88] sm:$0xff]  ;;  %v471_v57 = vld [vmem:[%s766_s3 + $0x80] sm:$0xff] }
  0x27   : > { %316 = vmatpush.msra.mxu1 %v259_v25  ;;  %359 = vmatpush.msra.mxu2 %v494_v24  ;;  %247 = vst [vmem:[#allocation2 + $0x1] sm:$0xff] %v245_v45  ;;  %v252_v55 = vld [vmem:[%s766_s3 + $0x8] sm:$0xff]  ;;  %v251_v58 = vld [vmem:[%s766_s3] sm:$0xff] }
  0x28   : > { %294 = vmatpush.msra.mxu0 %v478_v27  ;;  %515 = vmatpush.msra.mxu3 %v478_v27  ;;  %248 = vst [vmem:[#allocation2 + $0x9] sm:$0xff] %v246_v46  ;;  %v376_v22 = vld [vmem:[%s768_s5] sm:$0x1]  ;;  %v386_v25 = vld [vmem:[%s768_s5 + $0x1] sm:$0x1] }
  0x29   : > { %317 = vmatpush.msra.mxu1 %v258_v28  ;;  %360 = vmatpush.msra.mxu2 %v493_v26 }
  0x2a   : > { %295 = vmatpush.msra.mxu0 %v477_v32  ;;  %516 = vmatpush.msra.mxu3 %v477_v32 }
  0x2b   : > { %318 = vmatpush.msra.mxu1 %v257_v34  ;;  %361 = vmatpush.msra.mxu2 %v492_v37 }
  0x2c   : > { %296 = vmatpush.msra.mxu0 %v476_v38  ;;  %517 = vmatpush.msra.mxu3 %v476_v38 }
  0x2d   : > { %319 = vmatpush.msra.mxu1 %v256_v39  ;;  %362 = vmatpush.msra.mxu2 %v491_v42 }
  0x2e   : > { %297 = vmatpush.msra.mxu0 %v475_v43  ;;  %518 = vmatpush.msra.mxu3 %v475_v43  ;;  %v249_v59 = vld [vmem:[#allocation2] sm:$0xff] }
  0x2f   : > { %320 = vmatpush.msra.mxu1 %v255_v44  ;;  %363 = vmatpush.msra.mxu2 %v490_v47  ;;  %v332_v60 = vld [vmem:[#allocation2 + $0x2] sm:$0xff]  ;;  %v333_v61 = vld [vmem:[#allocation2 + $0xa] sm:$0xff] }
  0x30   : > { %298 = vmatpush.msra.mxu0 %v474_v48  ;;  %519 = vmatpush.msra.mxu3 %v474_v48  ;;  %v250_v62 = vld [vmem:[#allocation2 + $0x8] sm:$0xff] }
  0x31   : > { %321 = vmatpush.msra.mxu1 %v254_v49  ;;  %364 = vmatpush.msra.mxu2 %v489_v50 }
  0x32   : > { %299 = vmatpush.msra.mxu0 %v473_v51  ;;  %520 = vmatpush.msra.mxu3 %v473_v51 }
  0x33   : > { %322 = vmatpush.msra.mxu1 %v253_v52  ;;  %365 = vmatpush.msra.mxu2 %v488_v53 }
  0x34   : > { %300 = vmatpush.msra.mxu0 %v472_v54  ;;  %521 = vmatpush.msra.mxu3 %v472_v54 }
  0x35   : > { %323 = vmatpush.msra.mxu1 %v252_v55  ;;  %366 = vmatpush.msra.mxu2 %v487_v56 }
  0x36   : > { %301 = vmatpush.msra.mxu0 %v471_v57  ;;  %367 = vmatmul.f32.vlgmr.msra.gmra.mxu2 %v332_v60 }
  0x37   : > { %324 = vmatpush.msra.mxu1 %v251_v58  ;;  %302 = vmatmul.f32.vlgmr.msra.gmra.mxu0 %v245_v45 }
  0x38   : > { %325 = vmatmul.f32.vlgmr.msra.gmra.mxu1 %v249_v59  ;;  %522 = vmatpush.msra.mxu3 %v471_v57 }
  0x39   : > { %305 = vmatmul.f32.vlgmr.msra.gmra.mxu3 %v246_v46 }
  0x3e   : > { %370 = vmatmul.f32.gmra.mxu2 %v333_v61 }
  0x40   : > { %328 = vmatmul.f32.gmra.mxu1 %v250_v62 }
  0xb4   : > { %v303_v63 = vpop.f32.mrf.mxu0 }
  0xb5   : > { %v326_v0 = vpop.f32.mrf.mxu1 }
  0xb6   : > { %v327_v1 = vadd.f32 %v326_v0, %v303_v63 }
  0xb9   : > { %v368_v2 = vpop.f32.mrf.mxu2 }
  0xba   : > { %v374_v3 = vadd.f32 %v368_v2, %v327_v1 }
  0xbc   : > { %398 = vst [vmem:[%s589_s27] sm:$0xff] %v374_v3  ;;  %v306_v4 = vpop.f32.mrf.mxu3  ;;  %v387_v9 = vmul.f32 %v374_v3, %v374_v3 }
  0xbd   : > { %v329_v5 = vpop.f32.mrf.mxu1 }
  0xbe   : > { %v330_v6 = vadd.f32 %v329_v5, %v306_v4 }
  0xc1   : > { %v371_v7 = vpop.f32.mrf.mxu2 }
  0xc2   : > { %v375_v8 = vadd.f32 %v371_v7, %v330_v6 }
  0xc4   : > { %v377_v10 = vadd.f32 %v375_v8, %v374_v3  ;;  %v388_v11 = vmul.f32 %v375_v8, %v375_v8  ;;  %399 = vst [vmem:[%s589_s27 + $0x8] sm:$0xff] %v375_v8 }
  0xc6   : > { %v378_v12 = vrot.slane %v377_v10, 4  ;;  %v389_v13 = vadd.f32 %v388_v11, %v387_v9 }
  0xc8   : > { %v379_v14 = vadd.f32 %v378_v12, %v377_v10  ;;  %v390_v15 = vrot.slane %v389_v13, 4 }
  0xca   : > { %v380_v16 = vrot.slane %v379_v14, 2  ;;  %v391_v17 = vadd.f32 %v390_v15, %v389_v13 }
  0xcc   : > { %v381_v18 = vadd.f32 %v380_v16, %v379_v14  ;;  %v392_v19 = vrot.slane %v391_v17, 2 }
  0xce   : > { %v382_v20 = vrot.slane %v381_v18, 1  ;;  %v393_v21 = vadd.f32 %v392_v19, %v391_v17 }
  0xd0   : > { %v383_v23 = vadd.f32 %v382_v20, %v381_v18  ;;  %v394_v24 = vrot.slane %v393_v21, 1 }
  0xd2   : > { %v384_v26 = vadd.f32 %v383_v23, %v376_v22  ;;  %v395_v27 = vadd.f32 %v394_v24, %v393_v21 }
  0xd4   : > { %385 = vst [vmem:[%s768_s5] sm:$0x1] %v384_v26  ;;  %v396_v28 = vadd.f32 %v395_v27, %v386_v25 }
  0xd6   : > { %397 = vst [vmem:[%s768_s5 + $0x1] sm:$0x1] %v396_v28 }
  0xd7 PF: > { %s16_s18 = sadd.s32 1, %s540_s18  }
  0xd8   : > { %p13_p5 = scmp.ge.s32.totalorder %s16_s18, 4  }
  0xda   :  { %15 = sbr.rel (!%p13_p5) target bundleno = 1 (0x1), region = 80 }

</bundles_post_ra>
